<compile_context>
chip_gen: v6e
topology: v6e:2x2x1
jax: 0.10.0
libtpu: 0.0.40
codegen_flags: <defaults>
</compile_context>

<pallas_src>
import functools

import jax
import jax.numpy as jnp
from jax import lax
from jax.experimental import pallas as pl
from jax.experimental.pallas import tpu as pltpu

_EPS = 1e-8          # matches F.cosine_similarity norm clamp
_NEG_INF = -1e30


def _round_up(x: int, m: int) -> int:
    return ((x + m - 1) // m) * m


def _pick_tiles(bp: int) -> tuple[int, int]:
    """Largest 128-multiple tiles dividing Bp; keep >=2 row tiles for megacore."""
    tm = 128
    for cand in (512, 256):
        if bp % cand == 0 and bp // cand >= 2:
            tm = cand
            break
    tn = 128
    for cand in (512, 256):
        if bp % cand == 0:
            tn = cand
            break
    return tm, tn


def _bf16_eup_supported() -> bool:
    """bf16 exp on the EUP is a win on v6e/v7x; avoid on v5e and older."""
    try:
        kind = jax.devices()[0].device_kind.lower()
    except Exception:
        return False
    return ("v6" in kind) or ("v7" in kind) or ("trillium" in kind)


def _fused_infonce_kernel(u_ref, vt_ref,                 # inputs
                          lse_row_ref, col_m_ref, col_l_ref,  # outputs
                          m_scr, l_scr,                   # scratch
                          *, b_actual: int, tm: int, tn: int,
                          mask: bool, bf16_exp: bool):
    """Grid: (row_tile i [parallel], col_tile j [arbitrary/reduction]).

    Per step: logits tile S[i*TM:(i+1)*TM, j*TN:(j+1)*TN] = (un/T) @ vn^T.
      - Row LSE accumulated online in scratch; emitted at the last j.
      - Column (max, sum-exp) partials for this row tile emitted every step.
    """
    i = pl.program_id(0)
    j = pl.program_id(1)

    @pl.when(j == 0)
    def _init():
        m_scr[...] = jnp.full_like(m_scr, _NEG_INF)
        l_scr[...] = jnp.zeros_like(l_scr)

    # (TM, TN) logits tile: bf16 MXU operands, f32 accumulation, plain (M,K)x(K,N).
    s = jnp.dot(u_ref[...], vt_ref[...], preferred_element_type=jnp.float32)

    if mask:  # static: emitted only when B was padded to Bp
        row = i * tm + lax.broadcasted_iota(jnp.int32, s.shape, 0)
        col = j * tn + lax.broadcasted_iota(jnp.int32, s.shape, 1)
        s = jnp.where((row < b_actual) & (col < b_actual), s, _NEG_INF)

    def _exp(x):
        if bf16_exp:
            return jnp.exp(x.astype(jnp.bfloat16)).astype(jnp.float32)
        return jnp.exp(x)

    # ---- row-wise online log-sum-exp (loss1 direction) -------------------
    m_old = m_scr[...]
    m_new = jnp.maximum(m_old, jnp.max(s, axis=1, keepdims=True))
    p_row = _exp(s - m_new)
    l_scr[...] = (l_scr[...] * jnp.exp(m_old - m_new)
                  + jnp.sum(p_row, axis=1, keepdims=True))
    m_scr[...] = m_new

    # ---- column-wise partial log-sum-exp for this row tile (loss2) -------
    m_col = jnp.max(s, axis=0, keepdims=True)          # (1, TN)
    p_col = _exp(s - m_col)
    l_col = jnp.sum(p_col, axis=0, keepdims=True)      # (1, TN)
    col_m_ref[...] = m_col.reshape(col_m_ref.shape)
    col_l_ref[...] = l_col.reshape(col_l_ref.shape)

    @pl.when(j == pl.num_programs(1) - 1)
    def _finalize():
        lse_row_ref[...] = m_scr[...] + jnp.log(l_scr[...])


@functools.partial(jax.jit, static_argnames=("temperature",))
def infonce_loss(u: jax.Array, v: jax.Array, temperature: float) -> jax.Array:
    """u, v: (B, D). Returns scalar loss1 + loss2 (float32), matching the spec."""
    assert u.shape == v.shape and u.ndim == 2
    B, D = u.shape
    Bp = _round_up(max(B, 1), 128)
    Dp = _round_up(max(D, 1), 128)
    inv_t = 1.0 / float(temperature)

    # ---- O(B*D) prologue (done once, outside the hot loop) ---------------
    u32 = u.astype(jnp.float32)
    v32 = v.astype(jnp.float32)
    un = u32 * lax.rsqrt(jnp.maximum(jnp.sum(u32 * u32, -1, keepdims=True),
                                     _EPS * _EPS))
    vn = v32 * lax.rsqrt(jnp.maximum(jnp.sum(v32 * v32, -1, keepdims=True),
                                     _EPS * _EPS))
    un_b = (un * inv_t).astype(jnp.bfloat16)   # 1/T folded into the u side
    vn_b = vn.astype(jnp.bfloat16)

    # Diagonal logits from the SAME bf16-rounded operands the MXU sees.
    diag = jnp.sum(un_b.astype(jnp.float32) * vn_b.astype(jnp.float32), axis=-1)

    # Pad once; pre-transpose v so the kernel contracts the standard (K, N) dim.
    u_p = jnp.pad(un_b, ((0, Bp - B), (0, Dp - D)))          # (Bp, Dp) bf16
    vt_p = jnp.pad(vn_b, ((0, Bp - B), (0, Dp - D))).T       # (Dp, Bp) bf16

    TM, TN = _pick_tiles(Bp)
    n_i, n_j = Bp // TM, Bp // TN
    bf16_exp = _bf16_eup_supported()

    kernel = functools.partial(
        _fused_infonce_kernel,
        b_actual=B, tm=TM, tn=TN, mask=(Bp != B), bf16_exp=bf16_exp)

    vmem_need = (2 * (TM * Dp + Dp * TN) * 2      # double-buffered bf16 inputs
                 + 8 * TM * TN * 4                # f32 logits/exp temporaries
                 + 4 * (TM + 4 * TN) * 4)         # outputs / scratch
    vmem_limit = int(min(64 * 1024 * 1024, max(32 * 1024 * 1024, vmem_need)))

    cost = pl.CostEstimate(
        flops=2 * Bp * Bp * Dp,
        transcendentals=2 * Bp * Bp,
        bytes_accessed=(Bp * Dp + n_i * Bp * Dp) * 2 + (Bp + 2 * n_i * Bp) * 4)

    lse_row, col_m, col_l = pl.pallas_call(
        kernel,
        out_shape=(
            jax.ShapeDtypeStruct((Bp, 1), jnp.float32),       # row logsumexp
            jax.ShapeDtypeStruct((n_i, 1, Bp), jnp.float32),  # col max partials
            jax.ShapeDtypeStruct((n_i, 1, Bp), jnp.float32),  # col sum-exp partials
        ),
        grid_spec=pltpu.PrefetchScalarGridSpec(
            num_scalar_prefetch=0,
            grid=(n_i, n_j),
            in_specs=[
                pl.BlockSpec((TM, Dp), lambda i, j: (i, 0)),   # u rows (bf16, 1/T)
                pl.BlockSpec((Dp, TN), lambda i, j: (0, j)),   # v^T cols (bf16)
            ],
            out_specs=[
                pl.BlockSpec((TM, 1), lambda i, j: (i, 0)),
                pl.BlockSpec((1, 1, TN), lambda i, j: (i, 0, j)),
                pl.BlockSpec((1, 1, TN), lambda i, j: (i, 0, j)),
            ],
            scratch_shapes=[
                pltpu.VMEM((TM, 1), jnp.float32),   # running row max
                pltpu.VMEM((TM, 1), jnp.float32),   # running row sum-exp
            ],
        ),
        compiler_params=pltpu.CompilerParams(
            dimension_semantics=("parallel", "arbitrary"),
            vmem_limit_bytes=vmem_limit),
        cost_estimate=cost,
    )(u_p, vt_p)

    # ---- tiny XLA epilogue: merge column partials across row tiles --------
    col_m = col_m[:, 0, :]                                    # (n_i, Bp)
    col_l = col_l[:, 0, :]
    m_c = jnp.max(col_m, axis=0)                              # (Bp,)
    l_c = jnp.sum(col_l * jnp.exp(col_m - m_c[None, :]), axis=0)
    lse_col = m_c + jnp.log(l_c)

    ce_row = lse_row[:B, 0] - diag     # CE(sim(u, v), arange(B)) per row
    ce_col = lse_col[:B] - diag        # CE(sim(v, u), arange(B)) per row
    return jnp.mean(ce_row) + jnp.mean(ce_col)


def _infonce_ref(u, v, temperature):
    # pure-JAX f32 reference for sanity checking
    eps = 1e-8
    un = u / jnp.maximum(jnp.linalg.norm(u, axis=-1, keepdims=True), eps)
    vn = v / jnp.maximum(jnp.linalg.norm(v, axis=-1, keepdims=True), eps)
    s = (un @ vn.T) / temperature
    labels = jnp.arange(u.shape[0])
    loss1 = -jnp.mean(jax.nn.log_softmax(s, axis=-1)[labels, labels])
    loss2 = -jnp.mean(jax.nn.log_softmax(s.T, axis=-1)[labels, labels])
    return loss1 + loss2


if __name__ == "__main__":
    key = jax.random.PRNGKey(0)
    ku, kv, ku2, kv2 = jax.random.split(key, 4)
    temperature = 0.07

    # Small shape consistent with the module (batch of paired embeddings).
    B, D = 8, 32
    u = jax.random.normal(ku, (B, D), dtype=jnp.float32)
    v = jax.random.normal(kv, (B, D), dtype=jnp.float32)
    loss = infonce_loss(u, v, temperature)
    jax.block_until_ready(loss)
    ref = _infonce_ref(u, v, temperature)
    # bf16 MXU operands -> allow ~1e-2-level deviation vs the f32 reference.
    assert jnp.allclose(loss, ref, atol=5e-2, rtol=2e-2), (loss, ref)

    # Padded, multi-tile case: exercises masking, fused row+column LSE paths
    # and the cross-row-tile column-partial merge.
    B2, D2 = 300, 200
    u2 = jax.random.normal(ku2, (B2, D2), dtype=jnp.float32)
    v2 = jax.random.normal(kv2, (B2, D2), dtype=jnp.float32)
    loss2 = infonce_loss(u2, v2, temperature)
    jax.block_until_ready(loss2)
    ref2 = _infonce_ref(u2, v2, temperature)
    assert jnp.allclose(loss2, ref2, atol=5e-2, rtol=2e-2), (loss2, ref2)

    print("KERNEL_OK")
</pallas_src>

<mosaic_0001>
module attributes {stable_mosaic.version = 11 : i64} {
  func.func @_fused_infonce_kernel(%arg0: i32, %arg1: i32, %arg2: memref<128x128xbf16, #tpu.memory_space<vmem>>, %arg3: memref<128x128xbf16, #tpu.memory_space<vmem>>, %arg4: memref<128x1xf32, #tpu.memory_space<vmem>>, %arg5: memref<1x1x128xf32, #tpu.memory_space<vmem>>, %arg6: memref<1x1x128xf32, #tpu.memory_space<vmem>>, %arg7: memref<128x1xf32, #tpu.memory_space<vmem>>, %arg8: memref<128x1xf32, #tpu.memory_space<vmem>>) attributes {dimension_semantics = [#tpu.dimension_semantics<parallel>, #tpu.dimension_semantics<arbitrary>], iteration_bounds = array<i64: 1, 1>, scalar_prefetch = 0 : i64, scratch_operands = 2 : i64, tpu.core_type = #tpu.core_type<tc>, window_params = [{transform_indices = @transform_0, window_bounds = array<i64: 128, 128>}, {transform_indices = @transform_1, window_bounds = array<i64: 128, 128>}, {transform_indices = @transform_2, window_bounds = array<i64: 128, 1>}, {transform_indices = @transform_3, window_bounds = array<i64: 1, 1, 128>}, {transform_indices = @transform_4, window_bounds = array<i64: 1, 1, 128>}]} {
    %c0_i32 = arith.constant 0 : i32
    %0 = arith.cmpi eq, %arg1, %c0_i32 : i32
    %1 = arith.extui %0 : i1 to i32
    %c0_i32_0 = arith.constant 0 : i32
    %2 = arith.cmpi ne, %1, %c0_i32_0 : i32
    scf.if %2 {
      %cst_27 = arith.constant -1.000000e+30 : f32
      %51 = vector.broadcast %cst_27 : f32 to vector<128x1xf32>
      %c0_28 = arith.constant 0 : index
      %c0_29 = arith.constant 0 : index
      %52 = vector.load %arg7[%c0_28, %c0_29] : memref<128x1xf32, #tpu.memory_space<vmem>>, vector<128x1xf32>
      tpu.vector_store %arg7[%c0_28, %c0_29], %51 {strides = array<i32>} : memref<128x1xf32, #tpu.memory_space<vmem>>, vector<128x1xf32>,
      %cst_30 = arith.constant 0.000000e+00 : f32
      %53 = vector.broadcast %cst_30 : f32 to vector<128x1xf32>
      %c0_31 = arith.constant 0 : index
      %c0_32 = arith.constant 0 : index
      %54 = vector.load %arg8[%c0_31, %c0_32] : memref<128x1xf32, #tpu.memory_space<vmem>>, vector<128x1xf32>
      tpu.vector_store %arg8[%c0_31, %c0_32], %53 {strides = array<i32>} : memref<128x1xf32, #tpu.memory_space<vmem>>, vector<128x1xf32>,
    } else {
    }
    %c0 = arith.constant 0 : index
    %c0_1 = arith.constant 0 : index
    %3 = vector.load %arg2[%c0, %c0_1] : memref<128x128xbf16, #tpu.memory_space<vmem>>, vector<128x128xbf16>
    %c0_2 = arith.constant 0 : index
    %c0_3 = arith.constant 0 : index
    %4 = vector.load %arg3[%c0_2, %c0_3] : memref<128x128xbf16, #tpu.memory_space<vmem>>, vector<128x128xbf16>
    %cst = arith.constant dense<0.000000e+00> : vector<128x128xf32>
    %5 = tpu.matmul %3, %4, %cst {dimension_numbers = #tpu.dot_dimension_numbers<[1], [0], [0], [1], [0, 0, 1, 1], [], []>} : vector<128x128xbf16>, vector<128x128xbf16>, vector<128x128xf32> -> vector<128x128xf32>
    %c128_i32 = arith.constant 128 : i32
    %6 = arith.muli %arg0, %c128_i32 : i32
    %7 = tpu.iota {dimensions = array<i32: 0>} : vector<128x128xi32>
    %8 = vector.broadcast %6 : i32 to vector<128x128xi32>
    %9 = arith.addi %8, %7 : vector<128x128xi32>
    %c128_i32_4 = arith.constant 128 : i32
    %10 = arith.muli %arg1, %c128_i32_4 : i32
    %11 = tpu.iota {dimensions = array<i32: 1>} : vector<128x128xi32>
    %12 = vector.broadcast %10 : i32 to vector<128x128xi32>
    %13 = arith.addi %12, %11 : vector<128x128xi32>
    %c8_i32 = arith.constant 8 : i32
    %14 = vector.broadcast %c8_i32 : i32 to vector<128x128xi32>
    %15 = arith.cmpi slt, %9, %14 : vector<128x128xi32>
    %c8_i32_5 = arith.constant 8 : i32
    %16 = vector.broadcast %c8_i32_5 : i32 to vector<128x128xi32>
    %17 = arith.cmpi slt, %13, %16 : vector<128x128xi32>
    %18 = arith.andi %15, %17 : vector<128x128xi1>
    %cst_6 = arith.constant -1.000000e+30 : f32
    %19 = vector.broadcast %cst_6 : f32 to vector<128x128xf32>
    %20 = arith.select %18, %5, %19 : vector<128x128xi1>, vector<128x128xf32>
    %c0_7 = arith.constant 0 : index
    %c0_8 = arith.constant 0 : index
    %21 = vector.load %arg7[%c0_7, %c0_8] : memref<128x1xf32, #tpu.memory_space<vmem>>, vector<128x1xf32>
    %cst_9 = arith.constant dense<0xFF800000> : vector<128xf32>
    %22 = vector.multi_reduction <maximumf>, %20, %cst_9 [1] : vector<128x128xf32> to vector<128xf32>
    %23 = vector.shape_cast %22 : vector<128xf32> to vector<128x1xf32>
    %24 = arith.maximumf %21, %23 : vector<128x1xf32>
    %25 = vector.broadcast %24 : vector<128x1xf32> to vector<128x128xf32>
    %26 = arith.subf %20, %25 : vector<128x128xf32>
    %27 = math.exp %26 : vector<128x128xf32>
    %c0_10 = arith.constant 0 : index
    %c0_11 = arith.constant 0 : index
    %28 = vector.load %arg8[%c0_10, %c0_11] : memref<128x1xf32, #tpu.memory_space<vmem>>, vector<128x1xf32>
    %29 = arith.subf %21, %24 : vector<128x1xf32>
    %30 = math.exp %29 : vector<128x1xf32>
    %31 = arith.mulf %28, %30 : vector<128x1xf32>
    %cst_12 = arith.constant dense<0.000000e+00> : vector<128xf32>
    %32 = vector.multi_reduction <add>, %27, %cst_12 [1] : vector<128x128xf32> to vector<128xf32>
    %33 = vector.shape_cast %32 : vector<128xf32> to vector<128x1xf32>
    %34 = arith.addf %31, %33 : vector<128x1xf32>
    %c0_13 = arith.constant 0 : index
    %c0_14 = arith.constant 0 : index
    %35 = vector.load %arg8[%c0_13, %c0_14] : memref<128x1xf32, #tpu.memory_space<vmem>>, vector<128x1xf32>
    tpu.vector_store %arg8[%c0_13, %c0_14], %34 {strides = array<i32>} : memref<128x1xf32, #tpu.memory_space<vmem>>, vector<128x1xf32>,
    %c0_15 = arith.constant 0 : index
    %c0_16 = arith.constant 0 : index
    %36 = vector.load %arg7[%c0_15, %c0_16] : memref<128x1xf32, #tpu.memory_space<vmem>>, vector<128x1xf32>
    tpu.vector_store %arg7[%c0_15, %c0_16], %24 {strides = array<i32>} : memref<128x1xf32, #tpu.memory_space<vmem>>, vector<128x1xf32>,
    %cst_17 = arith.constant dense<0xFF800000> : vector<128xf32>
    %37 = vector.multi_reduction <maximumf>, %20, %cst_17 [0] : vector<128x128xf32> to vector<128xf32>
    %38 = vector.shape_cast %37 : vector<128xf32> to vector<1x128xf32>
    %39 = vector.broadcast %38 : vector<1x128xf32> to vector<128x128xf32>
    %40 = arith.subf %20, %39 : vector<128x128xf32>
    %41 = math.exp %40 : vector<128x128xf32>
    %cst_18 = arith.constant dense<0.000000e+00> : vector<128xf32>
    %42 = vector.multi_reduction <add>, %41, %cst_18 [0] : vector<128x128xf32> to vector<128xf32>
    %43 = vector.shape_cast %42 : vector<128xf32> to vector<1x128xf32>
    %44 = vector.shape_cast %38 : vector<1x128xf32> to vector<1x1x128xf32>
    %c0_19 = arith.constant 0 : index
    %c0_20 = arith.constant 0 : index
    %c0_21 = arith.constant 0 : index
    %45 = vector.load %arg5[%c0_19, %c0_20, %c0_21] : memref<1x1x128xf32, #tpu.memory_space<vmem>>, vector<1x1x128xf32>
    tpu.vector_store %arg5[%c0_19, %c0_20, %c0_21], %44 {strides = array<i32>} : memref<1x1x128xf32, #tpu.memory_space<vmem>>, vector<1x1x128xf32>,
    %46 = vector.shape_cast %43 : vector<1x128xf32> to vector<1x1x128xf32>
    %c0_22 = arith.constant 0 : index
    %c0_23 = arith.constant 0 : index
    %c0_24 = arith.constant 0 : index
    %47 = vector.load %arg6[%c0_22, %c0_23, %c0_24] : memref<1x1x128xf32, #tpu.memory_space<vmem>>, vector<1x1x128xf32>
    tpu.vector_store %arg6[%c0_22, %c0_23, %c0_24], %46 {strides = array<i32>} : memref<1x1x128xf32, #tpu.memory_space<vmem>>, vector<1x1x128xf32>,
    %c0_i32_25 = arith.constant 0 : i32
    %48 = arith.cmpi eq, %arg1, %c0_i32_25 : i32
    %49 = arith.extui %48 : i1 to i32
    %c0_i32_26 = arith.constant 0 : i32
    %50 = arith.cmpi ne, %49, %c0_i32_26 : i32
    scf.if %50 {
      %c0_27 = arith.constant 0 : index
      %c0_28 = arith.constant 0 : index
      %51 = vector.load %arg7[%c0_27, %c0_28] : memref<128x1xf32, #tpu.memory_space<vmem>>, vector<128x1xf32>
      %c0_29 = arith.constant 0 : index
      %c0_30 = arith.constant 0 : index
      %52 = vector.load %arg8[%c0_29, %c0_30] : memref<128x1xf32, #tpu.memory_space<vmem>>, vector<128x1xf32>
      %53 = math.log %52 : vector<128x1xf32>
      %54 = arith.addf %51, %53 : vector<128x1xf32>
      %c0_31 = arith.constant 0 : index
      %c0_32 = arith.constant 0 : index
      %55 = vector.load %arg4[%c0_31, %c0_32] : memref<128x1xf32, #tpu.memory_space<vmem>>, vector<128x1xf32>
      tpu.vector_store %arg4[%c0_31, %c0_32], %54 {strides = array<i32>} : memref<128x1xf32, #tpu.memory_space<vmem>>, vector<128x1xf32>,
    } else {
    }
    return
  }
  func.func @transform_0(%arg0: i32, %arg1: i32) -> (i32, i32) {
    %c0_i32 = arith.constant 0 : i32
    %c0_i32_0 = arith.constant 0 : i32
    return %arg0, %c0_i32 : i32, i32
  }
  func.func @transform_1(%arg0: i32, %arg1: i32) -> (i32, i32) {
    %c0_i32 = arith.constant 0 : i32
    %c0_i32_0 = arith.constant 0 : i32
    return %c0_i32, %arg1 : i32, i32
  }
  func.func @transform_2(%arg0: i32, %arg1: i32) -> (i32, i32) {
    %c0_i32 = arith.constant 0 : i32
    %c0_i32_0 = arith.constant 0 : i32
    return %arg0, %c0_i32 : i32, i32
  }
  func.func @transform_3(%arg0: i32, %arg1: i32) -> (i32, i32, i32) {
    %c0_i32 = arith.constant 0 : i32
    %c0_i32_0 = arith.constant 0 : i32
    return %arg0, %c0_i32, %arg1 : i32, i32, i32
  }
  func.func @transform_4(%arg0: i32, %arg1: i32) -> (i32, i32, i32) {
    %c0_i32 = arith.constant 0 : i32
    %c0_i32_0 = arith.constant 0 : i32
    return %arg0, %c0_i32, %arg1 : i32, i32, i32
  }
}

</mosaic_0001>

<bundles_post_ra>
// kernel: infonce_loss.1
= control target key start
LH: loop header
LB: loop body
LE: loop exit
PB: predicated region body
PF: predicated region fallthrough
CT: control target
= control target key end

     0   :  { %v1123_v1 = vmov -1e+30   ;;  %vm19_vm0 = vcmask 7168   ;;  %v1124_v11 = vmov 0   ;;  %v1125_v61 = vmov 0.0   ;;  %s1550_s1 = inlined_call_operand.vmem [shape: bf16[128,128], index: 1, kind: input, shape index: {}]   ;;  %s1551_s0 = inlined_call_operand.vmem [shape: bf16[128,128], index: 0, kind: input, shape index: {}]   ;;  %s1552_s3 = inlined_call_operand.vmem [shape: f32[1,1,128], index: 3, kind: output, shape index: {1}]   ;;  %s1553_s4 = inlined_call_operand.vmem [shape: f32[1,1,128], index: 4, kind: output, shape index: {2}]   ;;  %s1554_s2 = inlined_call_operand.vmem [shape: f32[128,1], index: 2, kind: output, shape index: {0}]  }
   0x1   :  { %v1007_v0 = vld [vmem:[%s1550_s1 + $0x38] sm:$0xff]   ;;  %384 = vmax.xlane.f32.xlu0 %v1123_v1  ;;  %386 = vmax.xlane.f32.xlu1 %v1123_v1  ;;  %v1008_v2 = vld [vmem:[%s1550_s1 + $0x30] sm:$0xff]   ;;  %v1009_v3 = vld [vmem:[%s1550_s1 + $0x28] sm:$0xff]   ;;  %21 = vst.msk [vmem:[#allocation2 + $0x8] sm:$0xff] %vm19_vm0, %v1123_v1  ;;  %v313_v62 = vlaneseq }
   0x2   :  { %954 = vmatprep.subr.bf16.mxu0 %v1007_v0  ;;  %986 = vmatprep.subr.bf16.mxu1 %v1007_v0  ;;  %v1010_v4 = vld [vmem:[%s1550_s1 + $0x20] sm:$0xff]   ;;  %v1011_v6 = vld [vmem:[%s1550_s1 + $0x18] sm:$0xff]   ;;  %v1012_v7 = vld [vmem:[%s1550_s1 + $0x10] sm:$0xff]   ;;  %20 = vst.msk [vmem:[#allocation2] sm:$0xff] %vm19_vm0, %v1123_v1 }
   0x3   :  { %955 = vmatpush3.bf16.msra.mxu0 %v1007_v0  ;;  %994 = vmatpush3.bf16.msra.mxu1 %v1007_v0  ;;  %v1015_v5 = vld [vmem:[%s1551_s0] sm:$0xff]   ;;  %v1013_v8 = vld [vmem:[%s1550_s1 + $0x8] sm:$0xff]   ;;  %22 = vst.msk [vmem:[#allocation2 + $0x10] sm:$0xff] %vm19_vm0, %v1123_v1  ;;  %23 = vst.msk [vmem:[#allocation2 + $0x18] sm:$0xff] %vm19_vm0, %v1123_v1  ;;  %v314_v63 = vand.u32 127, %v313_v62 }
   0x4   :  { %956 = vmatprep.subr.bf16.mxu0 %v1008_v2  ;;  %987 = vmatprep.subr.bf16.mxu1 %v1008_v2  ;;  %v1014_v9 = vld [vmem:[%s1550_s1] sm:$0xff]   ;;  %v1016_v10 = vld [vmem:[%s1551_s0 + $0x8] sm:$0xff]   ;;  %24 = vst.msk [vmem:[#allocation2 + $0x20] sm:$0xff] %vm19_vm0, %v1123_v1  ;;  %25 = vst.msk [vmem:[#allocation2 + $0x28] sm:$0xff] %vm19_vm0, %v1123_v1 }
   0x5   :  { %388 = vmax.xlane.f32.xlu1 %v1123_v1  ;;  %390 = vmax.xlane.f32.xlu0 %v1123_v1  ;;  %26 = vst.msk [vmem:[#allocation2 + $0x30] sm:$0xff] %vm19_vm0, %v1123_v1  ;;  %27 = vst.msk [vmem:[#allocation2 + $0x38] sm:$0xff] %vm19_vm0, %v1123_v1  ;;  %vm333_vm1 = vcmp.lt.s32.totalorder %v314_v63, 8 }
   0x6   :  { %970 = vmatprep.mubr.bf16.mxu0 %v1015_v5  ;;  %28 = vst.msk [vmem:[#allocation2 + $0x40] sm:$0xff] %vm19_vm0, %v1123_v1  ;;  %29 = vst.msk [vmem:[#allocation2 + $0x48] sm:$0xff] %vm19_vm0, %v1123_v1  ;;  %1005 = vset.pattern.permute.xlu1 %v1124_v11 }
   0x7   :  { %957 = vmatpush3.bf16.msra.mxu0 %v1008_v2  ;;  %995 = vmatpush3.bf16.msra.mxu1 %v1008_v2  ;;  %30 = vst.msk [vmem:[#allocation2 + $0x50] sm:$0xff] %vm19_vm0, %v1123_v1  ;;  %31 = vst.msk [vmem:[#allocation2 + $0x58] sm:$0xff] %vm19_vm0, %v1123_v1 }
   0x8   :  { %958 = vmatprep.subr.bf16.mxu0 %v1009_v3  ;;  %988 = vmatprep.subr.bf16.mxu1 %v1009_v3  ;;  %32 = vst.msk [vmem:[#allocation2 + $0x60] sm:$0xff] %vm19_vm0, %v1123_v1  ;;  %33 = vst.msk [vmem:[#allocation2 + $0x68] sm:$0xff] %vm19_vm0, %v1123_v1  ;;  %v1227_v12 = vld [vmem:[#allocation2 + $0x8] sm:$0xff] }
   0x9   :  { %392 = vmax.xlane.f32.xlu1 %v1123_v1  ;;  %394 = vmax.xlane.f32.xlu0 %v1123_v1  ;;  %34 = vst.msk [vmem:[#allocation2 + $0x70] sm:$0xff] %vm19_vm0, %v1123_v1  ;;  %35 = vst.msk [vmem:[#allocation2 + $0x78] sm:$0xff] %vm19_vm0, %v1123_v1 }
   0xa   :  { %1006 = vset.pattern.permute.xlu0 %v1124_v11  ;;  %v1229_v13 = vld [vmem:[#allocation2 + $0x10] sm:$0xff]  ;;  %v1237_v18 = vld [vmem:[#allocation2 + $0x18] sm:$0xff]  ;;  %37 = vst.msk [vmem:[#allocation3 + $0x8] sm:$0xff] %vm19_vm0, %v1125_v61  ;;  %36 = vst.msk [vmem:[#allocation3] sm:$0xff] %vm19_vm0, %v1125_v61 }
   0xb   :  { %959 = vmatpush3.bf16.msra.mxu0 %v1009_v3  ;;  %996 = vmatpush3.bf16.msra.mxu1 %v1009_v3  ;;  %v1244_v19 = vld [vmem:[#allocation2 + $0x20] sm:$0xff]  ;;  %v1252_v24 = vld [vmem:[#allocation2 + $0x28] sm:$0xff]  ;;  %38 = vst.msk [vmem:[#allocation3 + $0x10] sm:$0xff] %vm19_vm0, %v1125_v61  ;;  %39 = vst.msk [vmem:[#allocation3 + $0x18] sm:$0xff] %vm19_vm0, %v1125_v61 }
   0xc   :  { %960 = vmatprep.subr.bf16.mxu0 %v1010_v4  ;;  %989 = vmatprep.subr.bf16.mxu1 %v1010_v4  ;;  %v1257_v25 = vld [vmem:[#allocation2 + $0x30] sm:$0xff]  ;;  %v1267_v30 = vld [vmem:[#allocation2 + $0x38] sm:$0xff]  ;;  %40 = vst.msk [vmem:[#allocation3 + $0x20] sm:$0xff] %vm19_vm0, %v1125_v61  ;;  %41 = vst.msk [vmem:[#allocation3 + $0x28] sm:$0xff] %vm19_vm0, %v1125_v61 }
   0xd   :  { %396 = vmax.xlane.f32.xlu1 %v1123_v1  ;;  %398 = vmax.xlane.f32.xlu0 %v1123_v1  ;;  %v1274_v32 = vld [vmem:[#allocation2 + $0x40] sm:$0xff]  ;;  %v1282_v36 = vld [vmem:[#allocation2 + $0x48] sm:$0xff]  ;;  %42 = vst.msk [vmem:[#allocation3 + $0x30] sm:$0xff] %vm19_vm0, %v1125_v61  ;;  %43 = vst.msk [vmem:[#allocation3 + $0x38] sm:$0xff] %vm19_vm0, %v1125_v61 }
   0xe   :  { %v1289_v38 = vld [vmem:[#allocation2 + $0x50] sm:$0xff]  ;;  %v1297_v42 = vld [vmem:[#allocation2 + $0x58] sm:$0xff]  ;;  %44 = vst.msk [vmem:[#allocation3 + $0x40] sm:$0xff] %vm19_vm0, %v1125_v61  ;;  %45 = vst.msk [vmem:[#allocation3 + $0x48] sm:$0xff] %vm19_vm0, %v1125_v61 }
   0xf   :  { %961 = vmatpush3.bf16.msra.mxu0 %v1010_v4  ;;  %997 = vmatpush3.bf16.msra.mxu1 %v1010_v4  ;;  %v1304_v44 = vld [vmem:[#allocation2 + $0x60] sm:$0xff]  ;;  %v1312_v48 = vld [vmem:[#allocation2 + $0x68] sm:$0xff]  ;;  %46 = vst.msk [vmem:[#allocation3 + $0x50] sm:$0xff] %vm19_vm0, %v1125_v61  ;;  %47 = vst.msk [vmem:[#allocation3 + $0x58] sm:$0xff] %vm19_vm0, %v1125_v61 }
  0x10   :  { %962 = vmatprep.subr.bf16.mxu0 %v1011_v6  ;;  %990 = vmatprep.subr.bf16.mxu1 %v1011_v6  ;;  %48 = vst.msk [vmem:[#allocation3 + $0x60] sm:$0xff] %vm19_vm0, %v1125_v61  ;;  %49 = vst.msk [vmem:[#allocation3 + $0x68] sm:$0xff] %vm19_vm0, %v1125_v61 }
  0x11   :  { %400 = vmax.xlane.f32.xlu1 %v1123_v1  ;;  %402 = vmax.xlane.f32.xlu0 %v1123_v1  ;;  %50 = vst.msk [vmem:[#allocation3 + $0x70] sm:$0xff] %vm19_vm0, %v1125_v61  ;;  %51 = vst.msk [vmem:[#allocation3 + $0x78] sm:$0xff] %vm19_vm0, %v1125_v61 }
  0x13   :  { %963 = vmatpush3.bf16.msra.mxu0 %v1011_v6  ;;  %998 = vmatpush3.bf16.msra.mxu1 %v1011_v6 }
  0x14   :  { %964 = vmatprep.subr.bf16.mxu0 %v1012_v7  ;;  %991 = vmatprep.subr.bf16.mxu1 %v1012_v7 }
  0x15   :  { %404 = vmax.xlane.f32.xlu1 %v1123_v1  ;;  %406 = vmax.xlane.f32.xlu0 %v1123_v1 }
  0x17   :  { %965 = vmatpush3.bf16.msra.mxu0 %v1012_v7  ;;  %999 = vmatpush3.bf16.msra.mxu1 %v1012_v7 }
  0x18   :  { %966 = vmatprep.subr.bf16.mxu0 %v1013_v8  ;;  %992 = vmatprep.subr.bf16.mxu1 %v1013_v8 }
  0x19   :  { %408 = vmax.xlane.f32.xlu1 %v1123_v1 }
  0x1b   :  { %967 = vmatpush3.bf16.msra.mxu0 %v1013_v8  ;;  %1000 = vmatpush3.bf16.msra.mxu1 %v1013_v8 }
  0x1c   :  { %968 = vmatprep.subr.bf16.mxu0 %v1014_v9  ;;  %993 = vmatprep.subr.bf16.mxu1 %v1014_v9 }
  0x1d   :  { %412 = vmax.xlane.f32.xlu1 %v1123_v1 }
  0x1f   :  { %969 = vmatpush3.bf16.msra.mxu0 %v1014_v9  ;;  %1001 = vmatpush3.bf16.msra.mxu1 %v1014_v9 }
  0x22   :  { %971 = vmatmul.mubr.bf16.vlgmr.msra.gmra.mxu0 %v1016_v10 }
  0x8a   :  { %v385_v14 = vpop.xlane.xlu0 %384  ;;  %v387_v15 = vpop.xlane.xlu1 %386 }
  0x8b   :  { %v1232_v16 = vmax.f32 %v1227_v12, %v385_v14  ;;  %v1235_v17 = vmax.f32 %v1229_v13, %v387_v15 }
  0x8d   :  { %704 = vst.msk [vmem:[#allocation2 + $0x8] sm:$0xff] %vm19_vm0, %v1232_v16  ;;  %437 = vperm.xlu1 %1005, %v1232_v16   ;;  %705 = vst.msk [vmem:[#allocation2 + $0x10] sm:$0xff] %vm19_vm0, %v1235_v17  ;;  %v575_v51 = vsub.f32 %v1227_v12, %v1232_v16  ;;  %v576_v52 = vsub.f32 %v1229_v13, %v1235_v17 }
  0x8e   :  { %v389_v20 = vpop.xlane.xlu1 %388  ;;  %v391_v22 = vpop.xlane.xlu0 %390 }
  0x8f   :  { %v1247_v21 = vmax.f32 %v1237_v18, %v389_v20  ;;  %v1250_v23 = vmax.f32 %v1244_v19, %v391_v22  ;;  %v1369_v22 = vld [vmem:[#allocation2 + $0x78] sm:$0xff] }
  0x91   :  { %442 = vperm.xlu1 %1005, %v1235_v17   ;;  %706 = vst.msk [vmem:[#allocation2 + $0x18] sm:$0xff] %vm19_vm0, %v1247_v21  ;;  %707 = vst.msk [vmem:[#allocation2 + $0x20] sm:$0xff] %vm19_vm0, %v1250_v23  ;;  %v577_v53 = vsub.f32 %v1237_v18, %v1247_v21  ;;  %v578_v54 = vsub.f32 %v1244_v19, %v1250_v23 }
  0x92   :  { %v393_v26 = vpop.xlane.xlu1 %392  ;;  %v395_v28 = vpop.xlane.xlu0 %394 }
  0x93   :  { %v1262_v27 = vmax.f32 %v1252_v24, %v393_v26  ;;  %v1265_v29 = vmax.f32 %v1257_v25, %v395_v28 }
  0x95   :  { %447 = vperm.xlu1 %1005, %v1247_v21   ;;  %708 = vst.msk [vmem:[#allocation2 + $0x28] sm:$0xff] %vm19_vm0, %v1262_v27  ;;  %709 = vst.msk [vmem:[#allocation2 + $0x30] sm:$0xff] %vm19_vm0, %v1265_v29  ;;  %v579_v55 = vsub.f32 %v1252_v24, %v1262_v27  ;;  %v580_v56 = vsub.f32 %v1257_v25, %v1265_v29  ;;  %v559_v24 = vld [vmem:[#allocation3 + $0x8] sm:$0xff] }
  0x96   :  { %v397_v31 = vpop.xlane.xlu1 %396  ;;  %v399_v34 = vpop.xlane.xlu0 %398 }
  0x97   :  { %v1277_v33 = vmax.f32 %v1267_v30, %v397_v31  ;;  %v1280_v35 = vmax.f32 %v1274_v32, %v399_v34  ;;  %v600_v12 = vmul.f32 1.442695, %v579_v55  ;;  %v602_v13 = vmul.f32 1.442695, %v580_v56  ;;  %v562_v56 = vld [vmem:[#allocation3 + $0x20] sm:$0xff] }
  0x99   :  { %452 = vperm.xlu1 %1005, %v1250_v23   ;;  %710 = vst.msk [vmem:[#allocation2 + $0x38] sm:$0xff] %vm19_vm0, %v1277_v33  ;;  %711 = vst.msk [vmem:[#allocation2 + $0x40] sm:$0xff] %vm19_vm0, %v1280_v35  ;;  %v581_v57 = vsub.f32 %v1267_v30, %v1277_v33  ;;  %v582_v58 = vsub.f32 %v1274_v32, %v1280_v35 }
  0x9a   :  { %v401_v37 = vpop.xlane.xlu1 %400  ;;  %v403_v40 = vpop.xlane.xlu0 %402 }
  0x9b   :  { %v1292_v39 = vmax.f32 %v1282_v36, %v401_v37  ;;  %v1295_v41 = vmax.f32 %v1289_v38, %v403_v40  ;;  %v604_v16 = vmul.f32 1.442695, %v581_v57  ;;  %v606_v18 = vmul.f32 1.442695, %v582_v58  ;;  %v563_v58 = vld [vmem:[#allocation3 + $0x28] sm:$0xff] }
  0x9d   :  { %457 = vperm.xlu1 %1005, %v1262_v27   ;;  %712 = vst.msk [vmem:[#allocation2 + $0x48] sm:$0xff] %vm19_vm0, %v1292_v39  ;;  %713 = vst.msk [vmem:[#allocation2 + $0x50] sm:$0xff] %vm19_vm0, %v1295_v41  ;;  %v583_v17 = vsub.f32 %v1282_v36, %v1292_v39  ;;  %v1555_v25 = vsub.f32 %v1289_v38, %v1295_v41  ;;  %v560_v36 = vld [vmem:[#allocation3 + $0x10] sm:$0xff] }
  0x9e   :  { %v405_v43 = vpop.xlane.xlu1 %404  ;;  %v407_v46 = vpop.xlane.xlu0 %406 }
  0x9f   :  { %v1307_v45 = vmax.f32 %v1297_v42, %v405_v43  ;;  %v1310_v47 = vmax.f32 %v1304_v44, %v407_v46  ;;  %v608_v21 = vmul.f32 1.442695, %v583_v17  ;;  %v610_v27 = vmul.f32 1.442695, %v1555_v25 }
  0xa1   :  { %462 = vperm.xlu1 %1005, %v1265_v29   ;;  %714 = vst.msk [vmem:[#allocation2 + $0x58] sm:$0xff] %vm19_vm0, %v1307_v45  ;;  %715 = vst.msk [vmem:[#allocation2 + $0x60] sm:$0xff] %vm19_vm0, %v1310_v47  ;;  %v585_v23 = vsub.f32 %v1297_v42, %v1307_v45  ;;  %v1556_v42 = vsub.f32 %v1304_v44, %v1310_v47 }
  0xa2   :  { %v409_v49 = vpop.xlane.xlu1 %408 }
  0xa3   :  { %v1320_v50 = vmax.f32 %v1312_v48, %v409_v49 }
  0xa5   :  { %467 = vperm.xlu1 %1005, %v1277_v33   ;;  %716 = vst.msk [vmem:[#allocation2 + $0x68] sm:$0xff] %vm19_vm0, %v1320_v50  ;;  %v612_v33 = vmul.f32 1.442695, %v585_v23  ;;  %v587_v32 = vsub.f32 %v1312_v48, %v1320_v50 }
  0xa6   :  { %v413_v15 = vpop.xlane.xlu1 %412 }
  0xa7   :  { %v1372_v26 = vmax.f32 %v1369_v22, %v413_v15 }
  0xa9   :  { %472 = vperm.xlu1 %1005, %v1280_v35   ;;  %718 = vst.msk [vmem:[#allocation2 + $0x78] sm:$0xff] %vm19_vm0, %v1372_v26 }
  0xad   :  { %482 = vperm.xlu1 %1005, %v1295_v41  }
  0xb1   :  { %492 = vperm.xlu1 %1005, %v1310_v47  }
  0xe2   :  { %v972_v0 = vpop.f32.mrf.mxu0 }
  0xe4   :  { %v214_v2 = vpop.f32.mrf.mxu0 }
  0xe5   :  { %v1364_v3 = vsel %vm333_vm1, %v214_v2, -1e+30 }
  0xe6   :  { %v719_v4 = vmax.f32 %v1364_v3, -1e+30  ;;  %382 = vmax.xlane.f32.xlu0 %v1364_v3  ;;  %v973_v5 = vpop.f32.mrf.mxu0 }
  0xe8   :  { %v723_v6 = vmax.f32 %v719_v4, -1e+30  ;;  %v217_v7 = vpop.f32.mrf.mxu0 }
  0xea   :  { %v727_v8 = vmax.f32 %v723_v6, -1e+30  ;;  %410 = vmax.xlane.f32.xlu0 %v1123_v1 }
  0xec   :  { %v731_v9 = vmax.f32 %v727_v8, -1e+30 }
  0xee   :  { %v733_v10 = vmax.f32 %v731_v9, -1e+30 }
  0xf0   :  { %v734_v11 = vrot.slane %v733_v10, 4 }
  0xf2   :  { %v735_v14 = vmax.f32 %v733_v10, %v734_v11 }
  0xf4   :  { %v736_v20 = vrot.slane %v735_v14, 2 }
  0xf6   :  { %v737_v28 = vmax.f32 %v735_v14, %v736_v20 }
  0xf8   :  { %v738_v31 = vrot.slane %v737_v28, 1 }
  0xfa   :  { %v739_v34 = vmax.f32 %v737_v28, %v738_v31  ;;  %v1017_v28 = vld [vmem:[%s1551_s0 + $0x20] sm:$0xff]   ;;  %v1018_v31 = vld [vmem:[%s1551_s0 + $0x28] sm:$0xff]  }
  0xfb   :  { %978 = vmatprep.mubr.bf16.mxu1 %v1017_v28 }
  0xfc   :  { %v740_v37 = vsub.f32 %v1364_v3, %v739_v34  ;;  %v741_v1 = vsub.f32 -1e+30, %v739_v34  ;;  %809 = vst [vmem:[%s1552_s3] sm:$0x1] %v739_v34  ;;  %v1019_v34 = vld [vmem:[%s1551_s0 + $0x10] sm:$0xff]   ;;  %979 = vmatmul.mubr.bf16.vlgmr.msra.gmra.mxu1 %v1018_v31 }
  0xfd   :  { %974 = vmatprep.mubr.bf16.mxu0 %v1019_v34 }
  0xfe   :  { %v756_v40 = vmul.f32 1.442695, %v740_v37  ;;  %v758_v43 = vmul.f32 1.442695, %v741_v1  ;;  %v1020_v1 = vld [vmem:[%s1551_s0 + $0x30] sm:$0xff]  }
  0xff   :  { %982 = vmatprep.mubr.bf16.mxu1 %v1020_v1 }
 0x100   :  { %1023 = vpow2.f32 %v756_v40  ;;  %477 = vperm.xlu0 %1006, %v1292_v39   ;;  %v1021_v40 = vld [vmem:[%s1551_s0 + $0x18] sm:$0xff]  }
 0x101   :  { %1025 = vpow2.f32 %v758_v43  ;;  %975 = vmatmul.mubr.bf16.gmra.mxu0 %v1021_v40 }
 0x104   :  { %487 = vperm.xlu0 %1006, %v1307_v45   ;;  %v614_v45 = vmul.f32 1.442695, %v1556_v42 }
 0x108   :  { %497 = vperm.xlu0 %1006, %v1320_v50  }
 0x10d   :  { %v1024_v46 = vpop.eup %1023 }
 0x10e   :  { %v1026_v49 = vpop.eup %1025 }
 0x10f   :  { %v788_v61 = vadd.f32 %v1026_v49, %v1024_v46 }
 0x111   :  { %v789_v62 = vadd.f32 %v1026_v49, %v788_v61  ;;  %v1022_v61 = vld [vmem:[%s1551_s0 + $0x38] sm:$0xff]  }
 0x112   :  { %983 = vmatmul.mubr.bf16.gmra.mxu1 %v1022_v61 }
 0x113   :  { %v790_v63 = vadd.f32 %v1026_v49, %v789_v62 }
 0x115   :  { %v791_v0 = vadd.f32 %v1026_v49, %v790_v63  ;;  %v438_v63 = vpop.permute.xlu1 %437 }
 0x116   :  { %v511_v28 = vsub.f32 -1e+30, %v438_v63 }
 0x117   :  { %v792_v2 = vadd.f32 %v1026_v49, %v791_v0 }
 0x118   :  { %v528_v34 = vmul.f32 1.442695, %v511_v28 }
 0x119   :  { %v793_v4 = vadd.f32 %v1026_v49, %v792_v2  ;;  %v443_v0 = vpop.permute.xlu1 %442 }
 0x11a   :  { %1027 = vpow2.f32 %v528_v34 }
 0x11b   :  { %v794_v5 = vadd.f32 %v1026_v49, %v793_v4  ;;  %v1404_v4 = vld [vmem:[#allocation2] sm:$0xff] }
 0x11d   :  { %v795_v6 = vadd.f32 %v1026_v49, %v794_v5  ;;  %v448_v2 = vpop.permute.xlu1 %447 }
 0x11e   :  { %v513_v1 = vsub.f32 -1e+30, %v448_v2 }
 0x11f   :  { %v796_v7 = vadd.f32 %v1026_v49, %v795_v6 }
 0x121   :  { %v797_v8 = vadd.f32 %v1026_v49, %v796_v7  ;;  %v453_v5 = vpop.permute.xlu1 %452 }
 0x123   :  { %v798_v9 = vadd.f32 %v1026_v49, %v797_v8  ;;  %v1409_v8 = vld [vmem:[#allocation2 + $0x70] sm:$0xff] }
 0x125   :  { %v799_v10 = vadd.f32 %v1026_v49, %v798_v9 }
 0x127   :  { %v800_v11 = vadd.f32 %v1026_v49, %v799_v10 }
 0x129   :  { %v801_v14 = vadd.f32 %v1026_v49, %v800_v11 }
 0x12b   :  { %v802_v15 = vadd.f32 %v1026_v49, %v801_v14  ;;  %v458_v14 = vpop.permute.xlu1 %457 }
 0x12d   :  { %v803_v20 = vrot.slane %v802_v15, 4 }
 0x12f   :  { %v804_v37 = vadd.f32 %v803_v20, %v802_v15  ;;  %v463_v20 = vpop.permute.xlu1 %462 }
 0x131   :  { %v805_v43 = vrot.slane %v804_v37, 2 }
 0x133   :  { %v806_v46 = vadd.f32 %v805_v43, %v804_v37  ;;  %v468_v31 = vpop.permute.xlu1 %467  ;;  %v512_v37 = vsub.f32 -1e+30, %v443_v0  ;;  %v514_v43 = vsub.f32 -1e+30, %v453_v5 }
 0x134   :  { %v517_v9 = vsub.f32 -1e+30, %v468_v31 }
 0x135   :  { %v807_v49 = vrot.slane %v806_v46, 1  ;;  %v530_v40 = vmul.f32 1.442695, %v512_v37 }
 0x136   :  { %v540_v0 = vmul.f32 1.442695, %v517_v9 }
 0x137   :  { %v808_v62 = vadd.f32 %v807_v49, %v806_v46  ;;  %v532_v46 = vmul.f32 1.442695, %v513_v1  ;;  %v515_v49 = vsub.f32 -1e+30, %v458_v14  ;;  %v473_v61 = vpop.permute.xlu1 %472  ;;  %1029 = vpow2.f32 %v530_v40  ;;  %v1028_v14 = vpop.eup %1027 }
 0x138   :  { %v518_v59 = vsub.f32 -1e+30, %v473_v61 }
 0x139   :  { %810 = vst [vmem:[%s1553_s4] sm:$0x1] %v808_v62  ;;  %1031 = vpow2.f32 %v532_v46  ;;  %v536_v15 = vmul.f32 1.442695, %v515_v49 }
 0x13a   :  { %v542_v5 = vmul.f32 1.442695, %v518_v59 }
 0x13b   :  { %v483_v60 = vpop.permute.xlu1 %482 }
 0x13c   :  { %v520_v34 = vsub.f32 -1e+30, %v483_v60 }
 0x13e   :  { %v546_v31 = vmul.f32 1.442695, %v520_v34 }
 0x13f   :  { %v493_v40 = vpop.permute.xlu1 %492 }
 0x144   :  { %v1030_v46 = vpop.eup %1029 }
 0x16f   :  { %v383_v6 = vpop.xlane.xlu0 %382 }
 0x170   :  { %v1407_v7 = vmax.f32 %v1404_v4, %v383_v6  ;;  %v534_v6 = vmul.f32 1.442695, %v514_v43  ;;  %v522_v43 = vsub.f32 -1e+30, %v493_v40 }
 0x172   :  { %703 = vst.msk [vmem:[#allocation2] sm:$0xff] %vm19_vm0, %v1407_v7  ;;  %432 = vperm.xlu0 %1006, %v1407_v7   ;;  %1033 = vpow2.f32 %v534_v6  ;;  %v550_v9 = vmul.f32 1.442695, %v522_v43 }
 0x173   :  { %v411_v10 = vpop.xlane.xlu0 %410  ;;  %1035 = vpow2.f32 %v536_v15  ;;  %v1032_v15 = vpop.eup %1031 }
 0x174   :  { %v1417_v11 = vmax.f32 %v1409_v8, %v411_v10  ;;  %v516_v10 = vsub.f32 -1e+30, %v463_v20 }
 0x176   :  { %717 = vst.msk [vmem:[#allocation2 + $0x70] sm:$0xff] %vm19_vm0, %v1417_v11  ;;  %507 = vperm.xlu0 %1006, %v1372_v26   ;;  %502 = vperm.xlu1 %1005, %v1417_v11   ;;  %v538_v63 = vmul.f32 1.442695, %v516_v10 }
 0x178   :  { %1037 = vpow2.f32 %v538_v63 }
 0x179   :  { %1039 = vpow2.f32 %v540_v0 }
 0x17a   :  { %1041 = vpow2.f32 %v542_v5 }
 0x17b   :  { %v478_v62 = vpop.permute.xlu0 %477 }
 0x17c   :  { %v519_v2 = vsub.f32 -1e+30, %v478_v62 }
 0x17e   :  { %v544_v37 = vmul.f32 1.442695, %v519_v2 }
 0x17f   :  { %v488_v28 = vpop.permute.xlu0 %487  ;;  %v1034_v59 = vpop.eup %1033 }
 0x180   :  { %v521_v1 = vsub.f32 -1e+30, %v488_v28  ;;  %1043 = vpow2.f32 %v544_v37  ;;  %v1036_v62 = vpop.eup %1035 }
 0x181   :  { %1045 = vpow2.f32 %v546_v31 }
 0x182   :  { %v548_v49 = vmul.f32 1.442695, %v521_v1 }
 0x183   :  { %v498_v20 = vpop.permute.xlu0 %497 }
 0x184   :  { %v523_v61 = vsub.f32 -1e+30, %v498_v20  ;;  %1047 = vpow2.f32 %v548_v49 }
 0x185   :  { %1049 = vpow2.f32 %v550_v9  ;;  %v1038_v6 = vpop.eup %1037 }
 0x186   :  { %v552_v60 = vmul.f32 1.442695, %v523_v61  ;;  %v1040_v10 = vpop.eup %1039 }
 0x187   :  { %v1042_v63 = vpop.eup %1041 }
 0x188   :  { %1051 = vpow2.f32 %v552_v60 }
 0x18d   :  { %v1044_v28 = vpop.eup %1043 }
 0x18e   :  { %v1046_v0 = vpop.eup %1045 }
 0x191   :  { %v1048_v2 = vpop.eup %1047 }
 0x192   :  { %v1050_v5 = vpop.eup %1049 }
 0x195   :  { %640 = vadd.xlane.f32.xlu0 %v1028_v14  ;;  %v1052_v34 = vpop.eup %1051 }
 0x199   :  { %642 = vadd.xlane.f32.xlu0 %v1030_v46 }
 0x19a   :  { %644 = vadd.xlane.f32.xlu1 %v1032_v15 }
 0x19d   :  { %646 = vadd.xlane.f32.xlu0 %v1034_v59 }
 0x19e   :  { %648 = vadd.xlane.f32.xlu1 %v1036_v62 }
 0x1a1   :  { %650 = vadd.xlane.f32.xlu0 %v1038_v6 }
 0x1a2   :  { %652 = vadd.xlane.f32.xlu1 %v1040_v10 }
 0x1a5   :  { %654 = vadd.xlane.f32.xlu0 %v1042_v63 }
 0x1a6   :  { %656 = vadd.xlane.f32.xlu1 %v1044_v28 }
 0x1a9   :  { %658 = vadd.xlane.f32.xlu0 %v1046_v0 }
 0x1aa   :  { %660 = vadd.xlane.f32.xlu1 %v1048_v2 }
 0x1ad   :  { %662 = vadd.xlane.f32.xlu0 %v1050_v5 }
 0x1ae   :  { %664 = vadd.xlane.f32.xlu1 %v1052_v34 }
 0x1bc   :  { %v980_v46 = vpop.f32.mrf.mxu1 }
 0x1bd   :  { %v564_v46 = vld [vmem:[#allocation3 + $0x30] sm:$0xff] }
 0x1be   :  { %v246_v9 = vpop.f32.mrf.mxu1 }
 0x1bf   :  { %v565_v9 = vld [vmem:[#allocation3 + $0x38] sm:$0xff] }
 0x1c0   :  { %v981_v60 = vpop.f32.mrf.mxu1 }
 0x1c1   :  { %v976_v49 = vpop.f32.mrf.mxu0 }
 0x1c2   :  { %v249_v6 = vpop.f32.mrf.mxu1 }
 0x1c3   :  { %v230_v59 = vpop.f32.mrf.mxu0 }
 0x1c5   :  { %v977_v62 = vpop.f32.mrf.mxu0 }
 0x1c7   :  { %v233_v10 = vpop.f32.mrf.mxu0 }
 0x1d2   :  { %v984_v63 = vpop.f32.mrf.mxu1 }
 0x1ed   :  { %v433_v14 = vpop.permute.xlu0 %432 }
 0x1ee   :  { %v510_v37 = vsub.f32 %v1364_v3, %v433_v14  ;;  %v262_v3 = vpop.f32.mrf.mxu1  ;;  %v592_v14 = vmul.f32 1.442695, %v575_v51 }
 0x1ef   :  { %v566_v3 = vld [vmem:[#allocation3 + $0x40] sm:$0xff] }
 0x1f0   :  { %v526_v1 = vmul.f32 1.442695, %v510_v37  ;;  %v985_v28 = vpop.f32.mrf.mxu1  ;;  %v594_v37 = vmul.f32 1.442695, %v576_v52  ;;  %v561_v52 = vld [vmem:[#allocation3 + $0x18] sm:$0xff] }
 0x1f1   :  { %v503_v40 = vpop.permute.xlu1 %502  ;;  %v508_v20 = vpop.permute.xlu0 %507 }
 0x1f2   :  { %1053 = vpow2.f32 %v526_v1  ;;  %v524_v31 = vsub.f32 -1e+30, %v503_v40  ;;  %v525_v43 = vsub.f32 -1e+30, %v508_v20  ;;  %v265_v2 = vpop.f32.mrf.mxu1  ;;  %v596_v1 = vmul.f32 1.442695, %v577_v53 }
 0x1f3   :  { %v598_v40 = vmul.f32 1.442695, %v578_v54  ;;  %v616_v53 = vmul.f32 1.442695, %v587_v32  ;;  %v570_v32 = vld [vmem:[#allocation3 + $0x60] sm:$0xff] }
 0x1f4   :  { %v554_v61 = vmul.f32 1.442695, %v524_v31  ;;  %v556_v15 = vmul.f32 1.442695, %v525_v43 }
 0x1f6   :  { %1055 = vpow2.f32 %v554_v61 }
 0x1f7   :  { %1057 = vpow2.f32 %v556_v15 }
 0x1f8   :  { %1059 = vpow2.f32 %v592_v14 }
 0x1f9   :  { %1061 = vpow2.f32 %v594_v37 }
 0x1fa   :  { %1063 = vpow2.f32 %v596_v1 }
 0x1fb   :  { %1065 = vpow2.f32 %v598_v40 }
 0x1fc   :  { %1067 = vpow2.f32 %v600_v12 }
 0x1fd   :  { %1069 = vpow2.f32 %v602_v13 }
 0x1fe   :  { %1071 = vpow2.f32 %v604_v16  ;;  %v568_v16 = vld [vmem:[#allocation3 + $0x50] sm:$0xff] }
 0x1ff   :  { %v1054_v0 = vpop.eup %1053  ;;  %1073 = vpow2.f32 %v606_v18 }
 0x200   :  { %638 = vadd.xlane.f32.xlu1 %v1054_v0  ;;  %1075 = vpow2.f32 %v608_v21  ;;  %v569_v21 = vld [vmem:[#allocation3 + $0x58] sm:$0xff] }
 0x201   :  { %1077 = vpow2.f32 %v610_v27 }
 0x202   :  { %1079 = vpow2.f32 %v612_v33 }
 0x203   :  { %v1056_v5 = vpop.eup %1055  ;;  %1081 = vpow2.f32 %v614_v45 }
 0x204   :  { %v1058_v34 = vpop.eup %1057  ;;  %666 = vadd.xlane.f32.xlu0 %v1056_v5  ;;  %1083 = vpow2.f32 %v616_v53  ;;  %v567_v5 = vld [vmem:[#allocation3 + $0x48] sm:$0xff] }
 0x205   :  { %668 = vadd.xlane.f32.xlu1 %v1058_v34  ;;  %v1060_v19 = vpop.eup %1059 }
 0x206   :  { %v623_v29 = vmul.f32 %v1060_v19, %v559_v24  ;;  %v1062_v30 = vpop.eup %1061 }
 0x207   :  { %v1064_v39 = vpop.eup %1063  ;;  %v624_v38 = vmul.f32 %v1062_v30, %v560_v36 }
 0x208   :  { %v1066_v41 = vpop.eup %1065  ;;  %v625_v55 = vmul.f32 %v1064_v39, %v561_v52 }
 0x209   :  { %v1068_v48 = vpop.eup %1067  ;;  %v626_v31 = vmul.f32 %v1066_v41, %v562_v56 }
 0x20a   :  { %v1070_v44 = vpop.eup %1069  ;;  %v627_v43 = vmul.f32 %v1068_v48, %v563_v58 }
 0x20b   :  { %v1072_v49 = vpop.eup %1071  ;;  %v628_v62 = vmul.f32 %v1070_v44, %v564_v46  ;;  %v816_v46 = vld [vmem:[#allocation2 + $0x10] sm:$0xff] }
 0x20c   :  { %v1074_v6 = vpop.eup %1073  ;;  %v629_v63 = vmul.f32 %v1072_v49, %v565_v9 }
 0x20d   :  { %v1076_v28 = vpop.eup %1075  ;;  %v630_v1 = vmul.f32 %v1074_v6, %v566_v3 }
 0x20e   :  { %v1078_v40 = vpop.eup %1077  ;;  %v631_v13 = vmul.f32 %v1076_v28, %v567_v5 }
 0x20f   :  { %v1080_v17 = vpop.eup %1079  ;;  %v632_v27 = vmul.f32 %v1078_v40, %v568_v16  ;;  %v820_v40 = vld [vmem:[#allocation2 + $0x30] sm:$0xff] }
 0x210   :  { %v633_v33 = vmul.f32 %v1080_v17, %v569_v21 }
 0x21e   :  { %v641_v35 = vpop.xlane.xlu0 %640 }
 0x21f   :  { %v671_v51 = vadd.f32 %v641_v35, %v623_v29  ;;  %v1082_v29 = vpop.eup %1081 }
 0x220   :  { %v1084_v35 = vpop.eup %1083 }
 0x221   :  { %688 = vst.msk [vmem:[#allocation3 + $0x8] sm:$0xff] %vm19_vm0, %v671_v51  ;;  %v571_v51 = vld [vmem:[#allocation3 + $0x68] sm:$0xff] }
 0x222   :  { %v643_v54 = vpop.xlane.xlu0 %642 }
 0x223   :  { %v672_v50 = vadd.f32 %v643_v54, %v624_v38  ;;  %v645_v57 = vpop.xlane.xlu1 %644  ;;  %v634_v38 = vmul.f32 %v1082_v29, %v570_v32  ;;  %v635_v54 = vmul.f32 %v1084_v35, %v571_v51  ;;  %v824_v35 = vld [vmem:[#allocation2 + $0x50] sm:$0xff] }
 0x224   :  { %v673_v20 = vadd.f32 %v645_v57, %v625_v55 }
 0x225   :  { %689 = vst.msk [vmem:[#allocation3 + $0x10] sm:$0xff] %vm19_vm0, %v672_v50  ;;  %v815_v50 = vld [vmem:[#allocation2 + $0x8] sm:$0xff] }
 0x226   :  { %690 = vst.msk [vmem:[#allocation3 + $0x18] sm:$0xff] %vm19_vm0, %v673_v20  ;;  %v647_v47 = vpop.xlane.xlu0 %646 }
 0x227   :  { %v674_v61 = vadd.f32 %v647_v47, %v626_v31  ;;  %v649_v15 = vpop.xlane.xlu1 %648 }
 0x228   :  { %v831_v59 = vld [vmem:[#allocation3 + $0x8] sm:$0xff]  ;;  %v675_v60 = vadd.f32 %v649_v15, %v627_v43  ;;  %v817_v15 = vld [vmem:[#allocation2 + $0x18] sm:$0xff] }
 0x229   :  { %1085 = vlog2.f32 %v831_v59  ;;  %691 = vst.msk [vmem:[#allocation3 + $0x20] sm:$0xff] %vm19_vm0, %v674_v61 }
 0x22a   :  { %692 = vst.msk [vmem:[#allocation3 + $0x28] sm:$0xff] %vm19_vm0, %v675_v60  ;;  %v651_v10 = vpop.xlane.xlu0 %650 }
 0x22b   :  { %v676_v0 = vadd.f32 %v651_v10, %v628_v62  ;;  %v653_v2 = vpop.xlane.xlu1 %652 }
 0x22c   :  { %v832_v34 = vld [vmem:[#allocation3 + $0x10] sm:$0xff]  ;;  %v677_v14 = vadd.f32 %v653_v2, %v629_v63  ;;  %v818_v63 = vld [vmem:[#allocation2 + $0x20] sm:$0xff] }
 0x22d   :  { %1087 = vlog2.f32 %v832_v34  ;;  %v833_v37 = vld [vmem:[#allocation3 + $0x18] sm:$0xff]  ;;  %693 = vst.msk [vmem:[#allocation3 + $0x30] sm:$0xff] %vm19_vm0, %v676_v0  ;;  %v819_v0 = vld [vmem:[#allocation2 + $0x28] sm:$0xff] }
 0x22e   :  { %1089 = vlog2.f32 %v833_v37  ;;  %694 = vst.msk [vmem:[#allocation3 + $0x38] sm:$0xff] %vm19_vm0, %v677_v14  ;;  %v655_v12 = vpop.xlane.xlu0 %654 }
 0x22f   :  { %v678_v18 = vadd.f32 %v655_v12, %v630_v1  ;;  %v657_v19 = vpop.xlane.xlu1 %656 }
 0x230   :  { %v834_v23 = vld [vmem:[#allocation3 + $0x20] sm:$0xff]  ;;  %v679_v24 = vadd.f32 %v657_v19, %v631_v13  ;;  %v821_v13 = vld [vmem:[#allocation2 + $0x38] sm:$0xff] }
 0x231   :  { %1091 = vlog2.f32 %v834_v23  ;;  %v835_v25 = vld [vmem:[#allocation3 + $0x28] sm:$0xff]  ;;  %695 = vst.msk [vmem:[#allocation3 + $0x40] sm:$0xff] %vm19_vm0, %v678_v18  ;;  %v822_v23 = vld [vmem:[#allocation2 + $0x40] sm:$0xff] }
 0x232   :  { %1093 = vlog2.f32 %v835_v25  ;;  %696 = vst.msk [vmem:[#allocation3 + $0x48] sm:$0xff] %vm19_vm0, %v679_v24  ;;  %v659_v30 = vpop.xlane.xlu0 %658  ;;  %v823_v25 = vld [vmem:[#allocation2 + $0x48] sm:$0xff] }
 0x233   :  { %v680_v36 = vadd.f32 %v659_v30, %v632_v27  ;;  %v661_v39 = vpop.xlane.xlu1 %660 }
 0x234   :  { %v836_v52 = vld [vmem:[#allocation3 + $0x30] sm:$0xff]  ;;  %v681_v42 = vadd.f32 %v661_v39, %v633_v33  ;;  %v825_v39 = vld [vmem:[#allocation2 + $0x58] sm:$0xff] }
 0x235   :  { %1095 = vlog2.f32 %v836_v52  ;;  %v837_v45 = vld [vmem:[#allocation3 + $0x38] sm:$0xff]  ;;  %697 = vst.msk [vmem:[#allocation3 + $0x50] sm:$0xff] %vm19_vm0, %v680_v36 }
 0x236   :  { %v1086_v41 = vpop.eup %1085  ;;  %1097 = vlog2.f32 %v837_v45  ;;  %698 = vst.msk [vmem:[#allocation3 + $0x58] sm:$0xff] %vm19_vm0, %v681_v42  ;;  %v663_v53 = vpop.xlane.xlu0 %662 }
 0x237   :  { %v849_v55 = vmul.f32 0.6931472, %v1086_v41  ;;  %v682_v56 = vadd.f32 %v663_v53, %v634_v38  ;;  %v665_v48 = vpop.xlane.xlu1 %664  ;;  %v826_v41 = vld [vmem:[#allocation2 + $0x60] sm:$0xff] }
 0x238   :  { %v838_v57 = vld [vmem:[#allocation3 + $0x40] sm:$0xff]  ;;  %v683_v58 = vadd.f32 %v665_v48, %v635_v54  ;;  %v827_v54 = vld [vmem:[#allocation2 + $0x68] sm:$0xff]  ;;  %v1557_v48 = vsub.f32 %v1404_v4, %v1407_v7  ;;  %v573_v7 = vld [vmem:[#allocation3 + $0x78] sm:$0xff] }
 0x239   :  { %v879_v20 = vadd.f32 %v849_v55, %v815_v50  ;;  %1099 = vlog2.f32 %v838_v57  ;;  %v839_v31 = vld [vmem:[#allocation3 + $0x48] sm:$0xff]  ;;  %699 = vst.msk [vmem:[#allocation3 + $0x60] sm:$0xff] %vm19_vm0, %v682_v56  ;;  %v589_v57 = vsub.f32 %v1369_v22, %v1372_v26 }
 0x23a   :  { %v1088_v44 = vpop.eup %1087  ;;  %1101 = vlog2.f32 %v839_v31  ;;  %700 = vst.msk [vmem:[#allocation3 + $0x68] sm:$0xff] %vm19_vm0, %v683_v58  ;;  %v590_v50 = vmul.f32 1.442695, %v1557_v48  ;;  %v1558_v58 = vsub.f32 %v1409_v8, %v1417_v11 }
 0x23b   :  { %v1090_v47 = vpop.eup %1089  ;;  %895 = vst.msk [vmem:[%s1554_s2 + $0x8] sm:$0xff] %vm19_vm0, %v879_v20  ;;  %v851_v43 = vmul.f32 0.6931472, %v1088_v44  ;;  %v620_v31 = vmul.f32 1.442695, %v589_v57 }
 0x23c   :  { %v853_v49 = vmul.f32 0.6931472, %v1090_v47  ;;  %v840_v61 = vld [vmem:[#allocation3 + $0x50] sm:$0xff]  ;;  %v618_v20 = vmul.f32 1.442695, %v1558_v58  ;;  %v558_v47 = vld [vmem:[#allocation3] sm:$0xff] }
 0x23d   :  { %v880_v9 = vadd.f32 %v851_v43, %v816_v46  ;;  %1103 = vlog2.f32 %v840_v61  ;;  %v841_v59 = vld [vmem:[#allocation3 + $0x58] sm:$0xff]  ;;  %v572_v61 = vld [vmem:[#allocation3 + $0x70] sm:$0xff] }
 0x23e   :  { %v1092_v60 = vpop.eup %1091  ;;  %v881_v62 = vadd.f32 %v853_v49, %v817_v15  ;;  %1105 = vlog2.f32 %v841_v59 }
 0x23f   :  { %v1094_v6 = vpop.eup %1093  ;;  %896 = vst.msk [vmem:[%s1554_s2 + $0x10] sm:$0xff] %vm19_vm0, %v880_v9  ;;  %v855_v10 = vmul.f32 0.6931472, %v1092_v60 }
 0x240   :  { %897 = vst.msk [vmem:[%s1554_s2 + $0x18] sm:$0xff] %vm19_vm0, %v881_v62  ;;  %v857_v3 = vmul.f32 0.6931472, %v1094_v6  ;;  %v842_v28 = vld [vmem:[#allocation3 + $0x60] sm:$0xff] }
 0x241   :  { %v882_v2 = vadd.f32 %v855_v10, %v818_v63  ;;  %1107 = vlog2.f32 %v842_v28  ;;  %v843_v5 = vld [vmem:[#allocation3 + $0x68] sm:$0xff] }
 0x242   :  { %v1096_v34 = vpop.eup %1095  ;;  %v883_v14 = vadd.f32 %v857_v3, %v819_v0  ;;  %1109 = vlog2.f32 %v843_v5  ;;  %v814_v3 = vld [vmem:[#allocation2] sm:$0xff] }
 0x243   :  { %v1098_v37 = vpop.eup %1097  ;;  %898 = vst.msk [vmem:[%s1554_s2 + $0x20] sm:$0xff] %vm19_vm0, %v882_v2  ;;  %v859_v1 = vmul.f32 0.6931472, %v1096_v34  ;;  %1111 = vpow2.f32 %v590_v50  ;;  %v828_v34 = vld [vmem:[#allocation2 + $0x70] sm:$0xff] }
 0x244   :  { %899 = vst.msk [vmem:[%s1554_s2 + $0x28] sm:$0xff] %vm19_vm0, %v883_v14  ;;  %v861_v12 = vmul.f32 0.6931472, %v1098_v37  ;;  %1113 = vpow2.f32 %v618_v20  ;;  %v829_v37 = vld [vmem:[#allocation2 + $0x78] sm:$0xff] }
 0x245   :  { %v884_v16 = vadd.f32 %v859_v1, %v820_v40  ;;  %1115 = vpow2.f32 %v620_v31 }
 0x246   :  { %v1100_v17 = vpop.eup %1099  ;;  %v885_v18 = vadd.f32 %v861_v12, %v821_v13 }
 0x247   :  { %v1102_v19 = vpop.eup %1101  ;;  %900 = vst.msk [vmem:[%s1554_s2 + $0x30] sm:$0xff] %vm19_vm0, %v884_v16  ;;  %v863_v21 = vmul.f32 0.6931472, %v1100_v17 }
 0x248   :  { %901 = vst.msk [vmem:[%s1554_s2 + $0x38] sm:$0xff] %vm19_vm0, %v885_v18  ;;  %v865_v24 = vmul.f32 0.6931472, %v1102_v19 }
 0x249   :  { %v886_v27 = vadd.f32 %v863_v21, %v822_v23 }
 0x24a   :  { %v1104_v29 = vpop.eup %1103  ;;  %v887_v30 = vadd.f32 %v865_v24, %v823_v25 }
 0x24b   :  { %v1106_v33 = vpop.eup %1105  ;;  %902 = vst.msk [vmem:[%s1554_s2 + $0x40] sm:$0xff] %vm19_vm0, %v886_v27  ;;  %v867_v32 = vmul.f32 0.6931472, %v1104_v29 }
 0x24c   :  { %903 = vst.msk [vmem:[%s1554_s2 + $0x48] sm:$0xff] %vm19_vm0, %v887_v30  ;;  %v869_v36 = vmul.f32 0.6931472, %v1106_v33 }
 0x24d   :  { %v888_v51 = vadd.f32 %v867_v32, %v824_v35 }
 0x24e   :  { %v1108_v52 = vpop.eup %1107  ;;  %v889_v42 = vadd.f32 %v869_v36, %v825_v39 }
 0x24f   :  { %v1110_v45 = vpop.eup %1109  ;;  %904 = vst.msk [vmem:[%s1554_s2 + $0x50] sm:$0xff] %vm19_vm0, %v888_v51  ;;  %v871_v38 = vmul.f32 0.6931472, %v1108_v52 }
 0x250   :  { %905 = vst.msk [vmem:[%s1554_s2 + $0x58] sm:$0xff] %vm19_vm0, %v889_v42  ;;  %v873_v53 = vmul.f32 0.6931472, %v1110_v45  ;;  %v1112_v44 = vpop.eup %1111 }
 0x251   :  { %v890_v55 = vadd.f32 %v871_v38, %v826_v41  ;;  %v622_v43 = vmul.f32 %v1112_v44, %v558_v47  ;;  %v1114_v46 = vpop.eup %1113 }
 0x252   :  { %v891_v56 = vadd.f32 %v873_v53, %v827_v54  ;;  %v1116_v15 = vpop.eup %1115  ;;  %v636_v22 = vmul.f32 %v1114_v46, %v572_v61 }
 0x253   :  { %906 = vst.msk [vmem:[%s1554_s2 + $0x60] sm:$0xff] %vm19_vm0, %v890_v55  ;;  %v637_v26 = vmul.f32 %v1116_v15, %v573_v7 }
 0x254   :  { %907 = vst.msk [vmem:[%s1554_s2 + $0x68] sm:$0xff] %vm19_vm0, %v891_v56 }
 0x289   :  { %v639_v49 = vpop.xlane.xlu1 %638 }
 0x28a   :  { %v670_v4 = vadd.f32 %v639_v49, %v622_v43 }
 0x28c   :  { %687 = vst.msk [vmem:[#allocation3] sm:$0xff] %vm19_vm0, %v670_v4 }
 0x28d   :  { %v667_v9 = vpop.xlane.xlu0 %666 }
 0x28e   :  { %v669_v59 = vpop.xlane.xlu1 %668  ;;  %v684_v8 = vadd.f32 %v667_v9, %v636_v22 }
 0x28f   :  { %v685_v11 = vadd.f32 %v669_v59, %v637_v26 }
 0x290   :  { %701 = vst.msk [vmem:[#allocation3 + $0x70] sm:$0xff] %vm19_vm0, %v684_v8 }
 0x291   :  { %702 = vst.msk [vmem:[#allocation3 + $0x78] sm:$0xff] %vm19_vm0, %v685_v11 }
 0x293   :  { %v830_v60 = vld [vmem:[#allocation3] sm:$0xff] }
 0x294   :  { %1117 = vlog2.f32 %v830_v60 }
 0x297   :  { %v844_v62 = vld [vmem:[#allocation3 + $0x70] sm:$0xff] }
 0x298   :  { %v845_v6 = vld [vmem:[#allocation3 + $0x78] sm:$0xff]  ;;  %1119 = vlog2.f32 %v844_v62 }
 0x299   :  { %1121 = vlog2.f32 %v845_v6 }
 0x2a1   :  { %v1118_v10 = vpop.eup %1117 }
 0x2a2   :  { %v847_v63 = vmul.f32 0.6931472, %v1118_v10 }
 0x2a4   :  { %v878_v28 = vadd.f32 %v847_v63, %v814_v3 }
 0x2a5   :  { %v1120_v0 = vpop.eup %1119 }
 0x2a6   :  { %v1122_v2 = vpop.eup %1121  ;;  %894 = vst.msk [vmem:[%s1554_s2] sm:$0xff] %vm19_vm0, %v878_v28  ;;  %v875_v5 = vmul.f32 0.6931472, %v1120_v0 }
 0x2a7   :  { %v877_v14 = vmul.f32 0.6931472, %v1122_v2 }
 0x2a8   :  { %v892_v1 = vadd.f32 %v875_v5, %v828_v34 }
 0x2a9   :  { %v893_v40 = vadd.f32 %v877_v14, %v829_v37 }
 0x2aa   :  { %908 = vst.msk [vmem:[%s1554_s2 + $0x70] sm:$0xff] %vm19_vm0, %v892_v1 }
 0x2ab   :  { %909 = vst.msk [vmem:[%s1554_s2 + $0x78] sm:$0xff] %vm19_vm0, %v893_v40 }

</bundles_post_ra>
